<compile_context>
chip_gen: v5e
topology: v5e:2x2
jax: 0.10.0
libtpu: 0.0.40
codegen_flags: <defaults>
</compile_context>

<pallas_src>
import functools

import jax
import jax.numpy as jnp
from jax.experimental import pallas as pl
from jax.experimental.pallas import tpu as pltpu


def _linear_sigmoid_kernel(x_ref, wt_ref, b_ref, o_ref):
    # x_ref:  (TB, D)   wt_ref: (D, T)   b_ref: (1, T)   o_ref: (TB, T)
    x = x_ref[...]
    wt = wt_ref[...]
    d_dims = wt.shape[0]

    # VPU path: accumulate D broadcast FMAs, skipping the MXU entirely.
    # Accumulator seeded with the f32 bias -> f32 accumulation throughout.
    acc = b_ref[...]                                  # (1, T) f32
    for d in range(d_dims):                           # D is tiny & static
        acc = acc + x[:, d : d + 1] * wt[d : d + 1, :]  # (TB,1)*(1,T)->(TB,T)

    o_ref[...] = jax.nn.sigmoid(acc).astype(o_ref.dtype)


@functools.partial(jax.jit, static_argnames=())
def linear_sigmoid(x, wt, b2):
    """sigmoid(x @ wt + b2) via a batch-tiled Pallas kernel.

    x:  (B, D) float32
    wt: (D, T) float32   (pre-transposed torch Linear weight)
    b2: (1, T) float32   (pre-reshaped bias)
    """
    B, D = x.shape
    T = wt.shape[1]

    # Batch tile: full array if small, else a multiple-of-8 tile <= 1024 rows.
    if B <= 1024:
        tb = B
    else:
        tb = 1024
    grid_b = pl.cdiv(B, tb)

    cost = pl.CostEstimate(
        flops=2 * B * D * T,
        transcendentals=B * T,
        bytes_accessed=4 * (B * D + D * T + T + B * T),
    )

    return pl.pallas_call(
        _linear_sigmoid_kernel,
        out_shape=jax.ShapeDtypeStruct((B, T), x.dtype),
        grid_spec=pltpu.PrefetchScalarGridSpec(
            num_scalar_prefetch=0,
            grid=(grid_b,),
            in_specs=[
                pl.BlockSpec((tb, D), lambda i: (i, 0)),   # x: tiled over batch
                pl.BlockSpec((D, T), lambda i: (0, 0)),    # weight: resident
                pl.BlockSpec((1, T), lambda i: (0, 0)),    # bias: resident
            ],
            out_specs=pl.BlockSpec((tb, T), lambda i: (i, 0)),
        ),
        compiler_params=pltpu.CompilerParams(
            dimension_semantics=("parallel",),
        ),
        cost_estimate=cost,
    )(x, wt, b2)


class NeuronNamed2:
    """JAX/Pallas port of the dummy torch module with named/None inputs."""

    def __init__(self, n_dims: int = 5, n_targets: int = 3, key=None):
        if key is None:
            key = jax.random.PRNGKey(0)
        kw, kb = jax.random.split(key)
        # torch.nn.Linear default init: U(-1/sqrt(fan_in), 1/sqrt(fan_in))
        bound = 1.0 / (n_dims ** 0.5)
        self.weight = jax.random.uniform(
            kw, (n_targets, n_dims), jnp.float32, minval=-bound, maxval=bound
        )
        self.bias = jax.random.uniform(
            kb, (n_targets,), jnp.float32, minval=-bound, maxval=bound
        )
        # Precompute kernel-friendly layouts once (perf review item):
        #   wt: (D, T) so the kernel does x @ wt; b2: (1, T) row vector.
        self.wt = jnp.asarray(self.weight.T)
        self.b2 = jnp.asarray(self.bias.reshape(1, n_targets))

    def __call__(self, input_x=None, input_y=None):
        x = input_y if input_x is None else input_x
        return linear_sigmoid(x, self.wt, self.b2)


if __name__ == "__main__":
    key = jax.random.PRNGKey(0)
    k_model, k_x = jax.random.split(key)

    n_dims, n_targets, batch = 5, 3, 2
    model = NeuronNamed2(n_dims=n_dims, n_targets=n_targets, key=k_model)

    # Mirrors _get_random_inputs: (None, randn(batch, 5)) -> goes through input_y.
    input_y = jax.random.normal(k_x, (batch, n_dims), jnp.float32)

    out = model(input_x=None, input_y=input_y)
    out = jax.block_until_ready(out)

    # Reference check in plain JAX.
    ref = jax.nn.sigmoid(input_y @ model.weight.T + model.bias)
    assert out.shape == (batch, n_targets)
    assert jnp.allclose(out, ref, atol=1e-5, rtol=1e-5)

    print("KERNEL_OK")
</pallas_src>

<mosaic_0001>
module attributes {stable_mosaic.version = 11 : i64} {
  func.func @_linear_sigmoid_kernel(%arg0: i32, %arg1: memref<2x5xf32, #tpu.memory_space<vmem>>, %arg2: memref<5x3xf32, #tpu.memory_space<vmem>>, %arg3: memref<1x3xf32, #tpu.memory_space<vmem>>, %arg4: memref<2x3xf32, #tpu.memory_space<vmem>>) attributes {dimension_semantics = [#tpu.dimension_semantics<parallel>], iteration_bounds = array<i64: 1>, scalar_prefetch = 0 : i64, scratch_operands = 0 : i64, tpu.core_type = #tpu.core_type<tc>, window_params = [{transform_indices = @transform_0, window_bounds = array<i64: 2, 5>}, {pipeline_mode = #tpu.pipeline_mode<synchronous>, transform_indices = @transform_1, window_bounds = array<i64: 5, 3>}, {pipeline_mode = #tpu.pipeline_mode<synchronous>, transform_indices = @transform_2, window_bounds = array<i64: 1, 3>}, {transform_indices = @transform_3, window_bounds = array<i64: 2, 3>}]} {
    %c0 = arith.constant 0 : index
    %c0_0 = arith.constant 0 : index
    %0 = vector.load %arg1[%c0, %c0_0] : memref<2x5xf32, #tpu.memory_space<vmem>>, vector<2x5xf32>
    %c0_1 = arith.constant 0 : index
    %c0_2 = arith.constant 0 : index
    %1 = vector.load %arg2[%c0_1, %c0_2] : memref<5x3xf32, #tpu.memory_space<vmem>>, vector<5x3xf32>
    %c0_3 = arith.constant 0 : index
    %c0_4 = arith.constant 0 : index
    %2 = vector.load %arg3[%c0_3, %c0_4] : memref<1x3xf32, #tpu.memory_space<vmem>>, vector<1x3xf32>
    %3 = vector.extract_strided_slice %0 {offsets = [0, 0], sizes = [2, 1], strides = [1, 1]} : vector<2x5xf32> to vector<2x1xf32>
    %4 = vector.extract_strided_slice %1 {offsets = [0, 0], sizes = [1, 3], strides = [1, 1]} : vector<5x3xf32> to vector<1x3xf32>
    %5 = vector.broadcast %3 : vector<2x1xf32> to vector<2x3xf32>
    %6 = vector.broadcast %4 : vector<1x3xf32> to vector<2x3xf32>
    %7 = arith.mulf %5, %6 : vector<2x3xf32>
    %8 = vector.broadcast %2 : vector<1x3xf32> to vector<2x3xf32>
    %9 = arith.addf %8, %7 : vector<2x3xf32>
    %10 = vector.extract_strided_slice %0 {offsets = [0, 1], sizes = [2, 1], strides = [1, 1]} : vector<2x5xf32> to vector<2x1xf32>
    %11 = vector.extract_strided_slice %1 {offsets = [1, 0], sizes = [1, 3], strides = [1, 1]} : vector<5x3xf32> to vector<1x3xf32>
    %12 = vector.broadcast %10 : vector<2x1xf32> to vector<2x3xf32>
    %13 = vector.broadcast %11 : vector<1x3xf32> to vector<2x3xf32>
    %14 = arith.mulf %12, %13 : vector<2x3xf32>
    %15 = arith.addf %9, %14 : vector<2x3xf32>
    %16 = vector.extract_strided_slice %0 {offsets = [0, 2], sizes = [2, 1], strides = [1, 1]} : vector<2x5xf32> to vector<2x1xf32>
    %17 = vector.extract_strided_slice %1 {offsets = [2, 0], sizes = [1, 3], strides = [1, 1]} : vector<5x3xf32> to vector<1x3xf32>
    %18 = vector.broadcast %16 : vector<2x1xf32> to vector<2x3xf32>
    %19 = vector.broadcast %17 : vector<1x3xf32> to vector<2x3xf32>
    %20 = arith.mulf %18, %19 : vector<2x3xf32>
    %21 = arith.addf %15, %20 : vector<2x3xf32>
    %22 = vector.extract_strided_slice %0 {offsets = [0, 3], sizes = [2, 1], strides = [1, 1]} : vector<2x5xf32> to vector<2x1xf32>
    %23 = vector.extract_strided_slice %1 {offsets = [3, 0], sizes = [1, 3], strides = [1, 1]} : vector<5x3xf32> to vector<1x3xf32>
    %24 = vector.broadcast %22 : vector<2x1xf32> to vector<2x3xf32>
    %25 = vector.broadcast %23 : vector<1x3xf32> to vector<2x3xf32>
    %26 = arith.mulf %24, %25 : vector<2x3xf32>
    %27 = arith.addf %21, %26 : vector<2x3xf32>
    %28 = vector.extract_strided_slice %0 {offsets = [0, 4], sizes = [2, 1], strides = [1, 1]} : vector<2x5xf32> to vector<2x1xf32>
    %29 = vector.extract_strided_slice %1 {offsets = [4, 0], sizes = [1, 3], strides = [1, 1]} : vector<5x3xf32> to vector<1x3xf32>
    %30 = vector.broadcast %28 : vector<2x1xf32> to vector<2x3xf32>
    %31 = vector.broadcast %29 : vector<1x3xf32> to vector<2x3xf32>
    %32 = arith.mulf %30, %31 : vector<2x3xf32>
    %33 = arith.addf %27, %32 : vector<2x3xf32>
    %34 = arith.negf %33 : vector<2x3xf32>
    %35 = math.exp %34 : vector<2x3xf32>
    %cst = arith.constant 1.000000e+00 : f32
    %36 = vector.broadcast %cst : f32 to vector<2x3xf32>
    %37 = arith.addf %36, %35 : vector<2x3xf32>
    %38 = arith.divf %36, %37 : vector<2x3xf32>
    %c0_5 = arith.constant 0 : index
    %c0_6 = arith.constant 0 : index
    %39 = vector.load %arg4[%c0_5, %c0_6] : memref<2x3xf32, #tpu.memory_space<vmem>>, vector<2x3xf32>
    tpu.vector_store %arg4[%c0_5, %c0_6], %38 {strides = array<i32>} : memref<2x3xf32, #tpu.memory_space<vmem>>, vector<2x3xf32>,
    return
  }
  func.func @transform_0(%arg0: i32) -> (i32, i32) {
    %c0_i32 = arith.constant 0 : i32
    %c0_i32_0 = arith.constant 0 : i32
    return %arg0, %c0_i32 : i32, i32
  }
  func.func @transform_1(%arg0: i32) -> (i32, i32) {
    %c0_i32 = arith.constant 0 : i32
    %c0_i32_0 = arith.constant 0 : i32
    %c0_i32_1 = arith.constant 0 : i32
    return %c0_i32, %c0_i32_0 : i32, i32
  }
  func.func @transform_2(%arg0: i32) -> (i32, i32) {
    %c0_i32 = arith.constant 0 : i32
    %c0_i32_0 = arith.constant 0 : i32
    %c0_i32_1 = arith.constant 0 : i32
    return %c0_i32, %c0_i32_0 : i32, i32
  }
  func.func @transform_3(%arg0: i32) -> (i32, i32) {
    %c0_i32 = arith.constant 0 : i32
    %c0_i32_0 = arith.constant 0 : i32
    return %arg0, %c0_i32 : i32, i32
  }
}

</mosaic_0001>

<bundles_post_ra>
// kernel: linear_sigmoid.1
= control target key start
LH: loop header
LB: loop body
LE: loop exit
PB: predicated region body
PF: predicated region fallthrough
CT: control target
= control target key end

     0   :  { %v138_v1 = vmov 0   ;;  %v139_v2 = vmov 2   ;;  %s176_s0 = inlined_call_operand.vmem [shape: f32[2,5], index: 0, kind: input, shape index: {}]   ;;  %s177_s1 = inlined_call_operand.vmem [shape: f32[5,3], index: 1, kind: input, shape index: {}]   ;;  %s178_s2 = inlined_call_operand.vmem [shape: f32[1,3], index: 2, kind: input, shape index: {}]   ;;  %s179_s3 = inlined_call_operand.hbm [shape: f32[2,3], index: 3, kind: output, shape index: {}]  }
   0x1   :  { %v15_v0 = vld [vmem:[%s176_s0] sm:$0x3]  ;;  %101 = vset.pattern.permute.xlu0 %v138_v1  ;;  %103 = vset.pattern.permute.xlu1 %v139_v2 }
   0x2   :  { %20 = vperm.xlu0 %101, %v15_v0   ;;  %37 = vperm.xlu1 %103, %v15_v0  }
   0x3   :  { %8 = vsyncpa [#allocation3], 0  ;;  %v140_v3 = vmov 4   ;;  %v141_v4 = vmov 1   ;;  %v142_v5 = vmov 3   ;;  %s85_s19 = sshll.u32 %s179_s3, 4  ;;  %s86_s19 = int_to_ptr.hbm [resolvable:$true] %s85_s19 }
   0x4   :  { %105 = vset.pattern.permute.xlu2 %v140_v3  ;;  %v16_v6 = vld [vmem:[%s177_s1] sm:$0x1f]  ;;  %s143_s1 = smov [#allocation2]   ;;  %vm76_vm3 = vcmask 17408  }
   0x5   :  { %51 = vperm.xlu2 %105, %v15_v0   ;;  %v23_v9 = vperm.slane %v16_v6, 0  ;;  %v107_v10 = vld [vmem:[%s178_s2] ss:$0 sm:$0xff]  ;;  %v33_v12 = vperm.slane %v16_v6, 1  ;;  %v40_v13 = vperm.slane %v16_v6, 2  ;;  %v47_v14 = vperm.slane %v16_v6, 3 }
   0x6   :  { %v54_v19 = vperm.slane %v16_v6, 4  ;;  %s83_s2 = sshll.u32 %s143_s1, 4  ;;  %s84_s2 = int_to_ptr.vmem [resolvable:$true] %s83_s2 }
   0xa   :  { %102 = vset.pattern.permute.xlu0 %v141_v4  ;;  %104 = vset.pattern.permute.xlu1 %v142_v5 }
   0xb   :  { %30 = vperm.xlu0 %102, %v15_v0   ;;  %44 = vperm.xlu1 %104, %v15_v0  }
  0x13   :  { %106 = vset.pattern.permute.xlu0 %v140_v3 }
  0x5f   :  { %v52_v20 = vpop.permute.xlu2 %51 }
  0x60   :  { %v55_v25 = vmul.f32 %v54_v19, %v52_v20 }
  0x74   :  { %v21_v7 = vpop.permute.xlu0 %20  ;;  %v38_v8 = vpop.permute.xlu1 %37 }
  0x75   :  { %v24_v11 = vmul.f32 %v23_v9, %v21_v7  ;;  %v41_v21 = vmul.f32 %v40_v13, %v38_v8 }
  0x77   :  { %v28_v17 = vadd.f32 %v107_v10, %v24_v11 }
  0x7d   :  { %v31_v15 = vpop.permute.xlu0 %30  ;;  %v45_v16 = vpop.permute.xlu1 %44 }
  0x7e   :  { %v34_v18 = vmul.f32 %v33_v12, %v31_v15  ;;  %v48_v23 = vmul.f32 %v47_v14, %v45_v16 }
  0x80   :  { %v35_v22 = vadd.f32 %v34_v18, %v28_v17 }
  0x82   :  { %v42_v24 = vadd.f32 %v41_v21, %v35_v22 }
  0x84   :  { %v49_v26 = vadd.f32 %v48_v23, %v42_v24 }
  0x86   :  { %v56_v27 = vadd.f32 %v55_v25, %v49_v26 }
  0x88   :  { %v94_v28 = vmul.f32 -1.442695, %v56_v27 }
  0x8a   :  { %108 = vpow2.f32 %v94_v28 }
  0x90   :  { %v109_v29 = vpop.eup %108 }
  0x91   :  { %v60_v30 = vadd.f32 1.0, %v109_v29 }
  0x93   :  { %110 = vrcp.f32 %v60_v30  ;;  %v72_v34 = vand.u32 2147483648, %v60_v30  ;;  %v70_v36 = vand.u32 2147483647, %v60_v30  ;;  %vm66_vm1 = vweird.f32 %v60_v30 }
  0x95   :  { %v73_v38 = vor.u32 1.1754944e-38, %v72_v34  ;;  %vm71_vm4 = vcmp.eq.f32.partialorder %v70_v36, 8.507059e+37 }
  0x99   :  { %v111_v31 = vpop.eup %110 }
  0x9a   :  { %v62_v32 = vmul.f32 %v111_v31, %v60_v30  ;;  %vm67_vm0 = vweird.f32 %v111_v31 }
  0x9b   :  { %vm68_vm2 = vmor %vm66_vm1, %vm67_vm0 }
  0x9c   :  { %v63_v33 = vsub.f32 1.0, %v62_v32 }
  0x9e   :  { %v64_v35 = vmul.f32 %v111_v31, %v63_v33 }
  0xa0   :  { %v65_v37 = vadd.f32 %v111_v31, %v64_v35 }
  0xa2   :  { %v69_v39 = vsel %vm68_vm2, %v111_v31, %v65_v37 }
  0xa3   :  { %v74_v40 = vsel %vm71_vm4, %v73_v38, %v69_v39 }
  0xa4   :  { %77 = vst.msk [vmem:[#allocation2] sm:$0x3] %vm76_vm3, %v74_v40 }
  0xa5   :  { %88 = dma.vmem_to_hbm [thread:$0]  %s84_s2, 32, %s86_s19, [#allocation3]  }
  0xa6   :  { %136 = dma.done.wait [#allocation3], 32  }
  0xa7   :  { %137 = vsyncadd [#allocation3], 4294967264 }
  0xa8   :  { %93 = vsyncpa [#allocation3], 1 }

</bundles_post_ra>
